<compile_context>
chip_gen: v5e
topology: v5e:2x2
jax: 0.10.0
libtpu: 0.0.40
codegen_flags: <defaults>
</compile_context>

<pallas_src>
import jax
import jax.numpy as jnp
from jax.experimental import pallas as pl
from jax.experimental.pallas import tpu as pltpu

# ---- model dims (small, consistent with the forward) ----
B = 2            # batch
C = 4            # ECG leads (in_chans)
L = 64           # signal length
P = 8            # patch size (conv kernel = stride)
D = 32           # embedding / resnet width (logical)
T = L // P       # tokens per signal after patchify
K = P * C        # flattened patch size
DP = 128         # lane-padded channel width (MXU/vreg aligned)
OUT_ROWS = 8     # sublane-full output slab rows
EPS = 1e-5


def ecg_resnet_kernel(xp_ref, wp_ref, bp_ref,
                      w1a_ref, t1a_ref, w1b_ref, t1b_ref,
                      w2a_ref, t2a_ref, w2b_ref, t2b_ref,
                      out_ref):
    rows = xp_ref.shape[0]          # tokens handled by this grid step (= T here)
    dpad = out_ref.shape[-1]        # 128 lanes

    # Signal-boundary masks generated in-kernel (no HBM traffic).  A grid step
    # only ever holds whole signals, so the token index within a signal is
    # simply row % T (T is a power of two -> cheap bitwise AND).
    tok = jax.lax.broadcasted_iota(jnp.int32, (rows, dpad), 0) % T
    not_first = tok != 0            # zero the "previous token" tap at t == 0
    not_last = tok != T - 1         # zero the "next token" tap at t == T-1

    def conv_bn(h, w_ref, shift_ref):
        # conv1d(k=3, pad=1) over tokens as ONE fused matmul: token shifts via
        # XLU sublane rolls (masked at signal boundaries), the 3 taps
        # concatenated on the lane axis at 128-aligned offsets, then a single
        # (rows, 3*128) @ (3*128, 128) MXU dot with bf16 operands / f32 accum.
        # BN scale is already folded into w; only the BN shift add remains.
        hp = jnp.where(not_first, pltpu.roll(h, shift=1, axis=0), 0.0)
        hn = jnp.where(not_last, pltpu.roll(h, shift=rows - 1, axis=0), 0.0)
        x3 = jnp.concatenate([hp, h, hn], axis=-1).astype(jnp.bfloat16)
        y = jnp.dot(x3, w_ref[...], preferred_element_type=jnp.float32)
        return y + shift_ref[...]

    # ---- patch embedding: (rows, K) @ (K, 128) + bias; activations stay 2-D,
    #      f32 between matmuls (v5e-friendly elementwise path) ----
    h0 = jnp.dot(xp_ref[...].astype(jnp.bfloat16), wp_ref[...],
                 preferred_element_type=jnp.float32) + bp_ref[...]

    def basic_block(h, wa, ta, wb, tb):
        a = jnp.maximum(conv_bn(h, wa, ta), 0.0)
        c = conv_bn(a, wb, tb)
        return jnp.maximum(c + h, 0.0)

    h1 = basic_block(h0, w1a_ref, t1a_ref, w1b_ref, t1b_ref)
    h2 = basic_block(h1, w2a_ref, t2a_ref, w2b_ref, t2b_ref)

    # ---- global average pool over this signal's tokens (fc = Identity);
    #      broadcast over sublanes so the store is a full, unmasked (8, 128)
    #      lane-dense slab ----
    pooled = jnp.mean(h2, axis=0, keepdims=True)
    out_ref[...] = jnp.broadcast_to(pooled, out_ref.shape)


def make_params(key):
    ks = list(jax.random.split(key, 22))   # no key reuse

    def nxt():
        return ks.pop(0)

    def bn_fold():
        gamma = 1.0 + 0.1 * jax.random.normal(nxt(), (1, D), jnp.float32)
        beta = 0.1 * jax.random.normal(nxt(), (1, D), jnp.float32)
        mean = 0.1 * jax.random.normal(nxt(), (1, D), jnp.float32)
        var = jnp.abs(jax.random.normal(nxt(), (1, D), jnp.float32)) + 0.5
        scale = gamma / jnp.sqrt(var + EPS)
        shift = beta - mean * scale
        return scale, shift

    # NOTE: importing real PyTorch Conv1d(C, D, P, stride=P) weights (D, C, P)
    # requires weight.permute(2, 1, 0).reshape(P * C, D) to match the
    # channel-fastest patch flatten order used in ecg_resnet_forward.
    wp = 0.1 * jax.random.normal(nxt(), (K, D), jnp.float32)
    bp = 0.1 * jax.random.normal(nxt(), (1, D), jnp.float32)

    w1a = 0.1 * jax.random.normal(nxt(), (3, D, D), jnp.float32)
    s1a, t1a = bn_fold()
    w1b = 0.1 * jax.random.normal(nxt(), (3, D, D), jnp.float32)
    s1b, t1b = bn_fold()
    w2a = 0.1 * jax.random.normal(nxt(), (3, D, D), jnp.float32)
    s2a, t2a = bn_fold()
    w2b = 0.1 * jax.random.normal(nxt(), (3, D, D), jnp.float32)
    s2b, t2b = bn_fold()

    return (wp, bp, w1a, s1a, t1a, w1b, s1b, t1b,
            w2a, s2a, t2a, w2b, s2b, t2b)


def ecg_resnet_forward(x, params):
    # x: (B, C, L) in PyTorch NCL convention.
    (wp, bp, w1a, s1a, t1a, w1b, s1b, t1b,
     w2a, s2a, t2a, w2b, s2b, t2b) = params
    b, c, l = x.shape
    t = l // P
    bt = b * t
    d = wp.shape[1]
    k = P * c

    # patchify: NCL -> NLC -> flat (B*T, P*C); flatten order is channel-fastest
    xp = jnp.transpose(x, (0, 2, 1)).reshape(bt, k).astype(jnp.float32)

    def pad_lanes(a):                      # zero-pad output channels to 128 lanes
        return jnp.pad(a, ((0, 0), (0, DP - d)))

    # fold eval-mode BN scale into the conv weights, fuse the 3 taps on the
    # contraction axis, zero-pad BOTH channel axes to 128 (padded channels stay
    # exactly zero through the whole network), and pre-cast MXU weights to bf16.
    def fold(w, s):
        wf = jnp.pad(w * s[None], ((0, 0), (0, DP - d), (0, DP - d)))
        return wf.reshape(3 * DP, DP).astype(jnp.bfloat16)

    wp_p = pad_lanes(wp).astype(jnp.bfloat16)        # (K, 128) bf16
    bp_p = pad_lanes(bp)                             # (1, 128) f32
    w1a_f, t1a_p = fold(w1a, s1a), pad_lanes(t1a)
    w1b_f, t1b_p = fold(w1b, s1b), pad_lanes(t1b)
    w2a_f, t2a_p = fold(w2a, s2a), pad_lanes(t2a)
    w2b_f, t2b_p = fold(w2b, s2b), pad_lanes(t2b)

    inputs = (xp, wp_p, bp_p, w1a_f, t1a_p, w1b_f, t1b_p,
              w2a_f, t2a_p, w2b_f, t2b_p)

    # one whole signal (T token rows) per grid step -> rolls never wrap across
    # a conv boundary, and the "parallel" axis shards over v7x's 2 TensorCores.
    grid = (b,)
    wmap = lambda i: (0, 0)                           # weights: resident block
    in_specs = [
        pl.BlockSpec((t, k), lambda i: (i, 0)),       # xp: one signal per step
        pl.BlockSpec((k, DP), wmap),                  # patch weight (bf16)
        pl.BlockSpec((1, DP), wmap),                  # patch bias (f32)
        pl.BlockSpec((3 * DP, DP), wmap), pl.BlockSpec((1, DP), wmap),   # blk1 conv a
        pl.BlockSpec((3 * DP, DP), wmap), pl.BlockSpec((1, DP), wmap),   # blk1 conv b
        pl.BlockSpec((3 * DP, DP), wmap), pl.BlockSpec((1, DP), wmap),   # blk2 conv a
        pl.BlockSpec((3 * DP, DP), wmap), pl.BlockSpec((1, DP), wmap),   # blk2 conv b
    ]
    out_specs = pl.BlockSpec((None, OUT_ROWS, DP), lambda i: (i, 0, 0))

    flops = b * (2 * t * k * DP + 4 * 2 * t * (3 * DP) * DP + t * DP)
    bytes_accessed = (xp.size * 4
                      + wp_p.size * 2 + 4 * (3 * DP * DP) * 2    # bf16 weights
                      + 5 * DP * 4                               # bias + shifts
                      + b * OUT_ROWS * DP * 4)                   # output slabs

    out = pl.pallas_call(
        ecg_resnet_kernel,
        out_shape=jax.ShapeDtypeStruct((b, OUT_ROWS, DP), jnp.float32),
        grid_spec=pltpu.PrefetchScalarGridSpec(
            num_scalar_prefetch=0, grid=grid,
            in_specs=in_specs, out_specs=out_specs),
        compiler_params=pltpu.CompilerParams(
            dimension_semantics=("parallel",),
            vmem_limit_bytes=32 * 1024 * 1024),
        cost_estimate=pl.CostEstimate(flops=int(flops), transcendentals=0,
                                      bytes_accessed=int(bytes_accessed)),
    )(*inputs)
    return out[:, 0, :d]          # un-pad: (B, D)


def ecg_resnet_reference(x, params):
    # pure-f32 JAX mirror of the original (unfolded, unpadded) module math.
    (wp, bp, w1a, s1a, t1a, w1b, s1b, t1b,
     w2a, s2a, t2a, w2b, s2b, t2b) = params
    b, c, l = x.shape
    t = l // P
    xp = jnp.transpose(x, (0, 2, 1)).reshape(b, t, P * c).astype(jnp.float32)
    h0 = jnp.einsum('btk,kd->btd', xp, wp) + bp[None]

    def conv3(h, w):
        zeros = jnp.zeros((b, 1, D), jnp.float32)
        hp = jnp.concatenate([zeros, h[:, :-1]], axis=1)
        hn = jnp.concatenate([h[:, 1:], zeros], axis=1)
        return (jnp.einsum('btd,de->bte', hp, w[0]) +
                jnp.einsum('btd,de->bte', h, w[1]) +
                jnp.einsum('btd,de->bte', hn, w[2]))

    def block(h, wa, sa, ta, wb, sb, tb):
        a = jnp.maximum(conv3(h, wa) * sa[None] + ta[None], 0.0)
        cc = conv3(a, wb) * sb[None] + tb[None]
        return jnp.maximum(cc + h, 0.0)

    h1 = block(h0, w1a, s1a, t1a, w1b, s1b, t1b)
    h2 = block(h1, w2a, s2a, t2a, w2b, s2b, t2b)
    return jnp.mean(h2, axis=1)


if __name__ == "__main__":
    key = jax.random.PRNGKey(0)
    kx, kp = jax.random.split(key)
    x = jax.random.normal(kx, (B, C, L), jnp.float32)   # ECG input, NCL
    params = make_params(kp)

    out = jax.block_until_ready(ecg_resnet_forward(x, params))
    ref = jax.block_until_ready(ecg_resnet_reference(x, params))

    assert out.shape == (B, D), out.shape
    err = float(jnp.max(jnp.abs(out - ref)))
    # kernel uses bf16 MXU operands (f32 accumulation); reference is pure f32,
    # so the parity tolerance is loosened vs. the old 1e-4 (per review).
    assert bool(jnp.allclose(out, ref, atol=5e-2, rtol=5e-2)), err
    print("KERNEL_OK")
</pallas_src>

<mosaic_0001>
module attributes {stable_mosaic.version = 11 : i64} {
  func.func @ecg_resnet_kernel(%arg0: i32, %arg1: memref<8x32xf32, #tpu.memory_space<vmem>>, %arg2: memref<32x128xbf16, #tpu.memory_space<vmem>>, %arg3: memref<1x128xf32, #tpu.memory_space<vmem>>, %arg4: memref<384x128xbf16, #tpu.memory_space<vmem>>, %arg5: memref<1x128xf32, #tpu.memory_space<vmem>>, %arg6: memref<384x128xbf16, #tpu.memory_space<vmem>>, %arg7: memref<1x128xf32, #tpu.memory_space<vmem>>, %arg8: memref<384x128xbf16, #tpu.memory_space<vmem>>, %arg9: memref<1x128xf32, #tpu.memory_space<vmem>>, %arg10: memref<384x128xbf16, #tpu.memory_space<vmem>>, %arg11: memref<1x128xf32, #tpu.memory_space<vmem>>, %arg12: memref<1x8x128xf32, #tpu.memory_space<vmem>>) attributes {dimension_semantics = [#tpu.dimension_semantics<parallel>], iteration_bounds = array<i64: 2>, scalar_prefetch = 0 : i64, scratch_operands = 0 : i64, tpu.core_type = #tpu.core_type<tc>, window_params = [{transform_indices = @transform_0, window_bounds = array<i64: 8, 32>}, {pipeline_mode = #tpu.pipeline_mode<synchronous>, transform_indices = @transform_1, window_bounds = array<i64: 32, 128>}, {pipeline_mode = #tpu.pipeline_mode<synchronous>, transform_indices = @transform_2, window_bounds = array<i64: 1, 128>}, {pipeline_mode = #tpu.pipeline_mode<synchronous>, transform_indices = @transform_3, window_bounds = array<i64: 384, 128>}, {pipeline_mode = #tpu.pipeline_mode<synchronous>, transform_indices = @transform_4, window_bounds = array<i64: 1, 128>}, {pipeline_mode = #tpu.pipeline_mode<synchronous>, transform_indices = @transform_5, window_bounds = array<i64: 384, 128>}, {pipeline_mode = #tpu.pipeline_mode<synchronous>, transform_indices = @transform_6, window_bounds = array<i64: 1, 128>}, {pipeline_mode = #tpu.pipeline_mode<synchronous>, transform_indices = @transform_7, window_bounds = array<i64: 384, 128>}, {pipeline_mode = #tpu.pipeline_mode<synchronous>, transform_indices = @transform_8, window_bounds = array<i64: 1, 128>}, {pipeline_mode = #tpu.pipeline_mode<synchronous>, transform_indices = @transform_9, window_bounds = array<i64: 384, 128>}, {pipeline_mode = #tpu.pipeline_mode<synchronous>, transform_indices = @transform_10, window_bounds = array<i64: 1, 128>}, {transform_indices = @transform_11, window_bounds = array<i64: 1, 8, 128>}]} {
    %0 = tpu.iota {dimensions = array<i32: 0>} : vector<8x128xi32>
    %c8_i32 = arith.constant 8 : i32
    %c0_i32 = arith.constant 0 : i32
    %1 = arith.cmpi eq, %c8_i32, %c0_i32 : i32
    %c1_i32 = arith.constant 1 : i32
    %2 = arith.select %1, %c1_i32, %c8_i32 : i32
    %3 = vector.broadcast %2 : i32 to vector<8x128xi32>
    %4 = arith.remsi %0, %3 : vector<8x128xi32>
    %c0_i32_0 = arith.constant 0 : i32
    %5 = vector.broadcast %c0_i32_0 : i32 to vector<8x128xi32>
    %6 = arith.cmpi ne, %4, %5 : vector<8x128xi32>
    %c0_i32_1 = arith.constant 0 : i32
    %7 = vector.broadcast %c0_i32_1 : i32 to vector<8x128xi32>
    %8 = arith.cmpi slt, %4, %7 : vector<8x128xi32>
    %c0_i32_2 = arith.constant 0 : i32
    %9 = arith.cmpi slt, %2, %c0_i32_2 : i32
    %10 = vector.broadcast %9 : i1 to vector<8x128xi1>
    %11 = vector.broadcast %10 : vector<8x128xi1> to vector<8x128xi1>
    %12 = arith.xori %8, %11 : vector<8x128xi1>
    %13 = arith.andi %12, %6 : vector<8x128xi1>
    %14 = vector.broadcast %2 : i32 to vector<8x128xi32>
    %15 = arith.addi %4, %14 : vector<8x128xi32>
    %16 = arith.select %13, %15, %4 : vector<8x128xi1>, vector<8x128xi32>
    %c0_i32_3 = arith.constant 0 : i32
    %17 = vector.broadcast %c0_i32_3 : i32 to vector<8x128xi32>
    %18 = arith.cmpi ne, %16, %17 : vector<8x128xi32>
    %c7_i32 = arith.constant 7 : i32
    %19 = vector.broadcast %c7_i32 : i32 to vector<8x128xi32>
    %20 = arith.cmpi ne, %16, %19 : vector<8x128xi32>
    %c0 = arith.constant 0 : index
    %c0_4 = arith.constant 0 : index
    %21 = vector.load %arg1[%c0, %c0_4] : memref<8x32xf32, #tpu.memory_space<vmem>>, vector<8x32xf32>
    %22 = arith.truncf %21 : vector<8x32xf32> to vector<8x32xbf16>
    %c0_5 = arith.constant 0 : index
    %c0_6 = arith.constant 0 : index
    %23 = vector.load %arg2[%c0_5, %c0_6] : memref<32x128xbf16, #tpu.memory_space<vmem>>, vector<32x128xbf16>
    %cst = arith.constant dense<0.000000e+00> : vector<8x128xf32>
    %24 = tpu.matmul %22, %23, %cst {dimension_numbers = #tpu.dot_dimension_numbers<[1], [0], [0], [1], [0, 0, 1, 1], [], []>} : vector<8x32xbf16>, vector<32x128xbf16>, vector<8x128xf32> -> vector<8x128xf32>
    %c0_7 = arith.constant 0 : index
    %c0_8 = arith.constant 0 : index
    %25 = vector.load %arg3[%c0_7, %c0_8] : memref<1x128xf32, #tpu.memory_space<vmem>>, vector<1x128xf32>
    %26 = vector.broadcast %25 : vector<1x128xf32> to vector<8x128xf32>
    %27 = arith.addf %24, %26 : vector<8x128xf32>
    %c1_i32_9 = arith.constant 1 : i32
    %28 = tpu.dynamic_rotate %27 by %c1_i32_9 dim 0 : vector<8x128xf32>, i32 -> vector<8x128xf32>
    %cst_10 = arith.constant 0.000000e+00 : f32
    %29 = vector.broadcast %cst_10 : f32 to vector<8x128xf32>
    %30 = arith.select %18, %28, %29 : vector<8x128xi1>, vector<8x128xf32>
    %c7_i32_11 = arith.constant 7 : i32
    %31 = tpu.dynamic_rotate %27 by %c7_i32_11 dim 0 : vector<8x128xf32>, i32 -> vector<8x128xf32>
    %cst_12 = arith.constant 0.000000e+00 : f32
    %32 = vector.broadcast %cst_12 : f32 to vector<8x128xf32>
    %33 = arith.select %20, %31, %32 : vector<8x128xi1>, vector<8x128xf32>
    %34 = tpu.concatenate %30, %27, %33 in 1 : vector<8x128xf32>, vector<8x128xf32>, vector<8x128xf32> -> vector<8x384xf32>
    %35 = arith.truncf %34 : vector<8x384xf32> to vector<8x384xbf16>
    %c0_13 = arith.constant 0 : index
    %c0_14 = arith.constant 0 : index
    %36 = vector.load %arg4[%c0_13, %c0_14] : memref<384x128xbf16, #tpu.memory_space<vmem>>, vector<384x128xbf16>
    %cst_15 = arith.constant dense<0.000000e+00> : vector<8x128xf32>
    %37 = tpu.matmul %35, %36, %cst_15 {dimension_numbers = #tpu.dot_dimension_numbers<[1], [0], [0], [1], [0, 0, 1, 1], [], []>} : vector<8x384xbf16>, vector<384x128xbf16>, vector<8x128xf32> -> vector<8x128xf32>
    %c0_16 = arith.constant 0 : index
    %c0_17 = arith.constant 0 : index
    %38 = vector.load %arg5[%c0_16, %c0_17] : memref<1x128xf32, #tpu.memory_space<vmem>>, vector<1x128xf32>
    %39 = vector.broadcast %38 : vector<1x128xf32> to vector<8x128xf32>
    %40 = arith.addf %37, %39 : vector<8x128xf32>
    %cst_18 = arith.constant 0.000000e+00 : f32
    %41 = vector.broadcast %cst_18 : f32 to vector<8x128xf32>
    %42 = arith.maximumf %40, %41 : vector<8x128xf32>
    %c1_i32_19 = arith.constant 1 : i32
    %43 = tpu.dynamic_rotate %42 by %c1_i32_19 dim 0 : vector<8x128xf32>, i32 -> vector<8x128xf32>
    %cst_20 = arith.constant 0.000000e+00 : f32
    %44 = vector.broadcast %cst_20 : f32 to vector<8x128xf32>
    %45 = arith.select %18, %43, %44 : vector<8x128xi1>, vector<8x128xf32>
    %c7_i32_21 = arith.constant 7 : i32
    %46 = tpu.dynamic_rotate %42 by %c7_i32_21 dim 0 : vector<8x128xf32>, i32 -> vector<8x128xf32>
    %cst_22 = arith.constant 0.000000e+00 : f32
    %47 = vector.broadcast %cst_22 : f32 to vector<8x128xf32>
    %48 = arith.select %20, %46, %47 : vector<8x128xi1>, vector<8x128xf32>
    %49 = tpu.concatenate %45, %42, %48 in 1 : vector<8x128xf32>, vector<8x128xf32>, vector<8x128xf32> -> vector<8x384xf32>
    %50 = arith.truncf %49 : vector<8x384xf32> to vector<8x384xbf16>
    %c0_23 = arith.constant 0 : index
    %c0_24 = arith.constant 0 : index
    %51 = vector.load %arg6[%c0_23, %c0_24] : memref<384x128xbf16, #tpu.memory_space<vmem>>, vector<384x128xbf16>
    %cst_25 = arith.constant dense<0.000000e+00> : vector<8x128xf32>
    %52 = tpu.matmul %50, %51, %cst_25 {dimension_numbers = #tpu.dot_dimension_numbers<[1], [0], [0], [1], [0, 0, 1, 1], [], []>} : vector<8x384xbf16>, vector<384x128xbf16>, vector<8x128xf32> -> vector<8x128xf32>
    %c0_26 = arith.constant 0 : index
    %c0_27 = arith.constant 0 : index
    %53 = vector.load %arg7[%c0_26, %c0_27] : memref<1x128xf32, #tpu.memory_space<vmem>>, vector<1x128xf32>
    %54 = vector.broadcast %53 : vector<1x128xf32> to vector<8x128xf32>
    %55 = arith.addf %52, %54 : vector<8x128xf32>
    %56 = arith.addf %55, %27 : vector<8x128xf32>
    %cst_28 = arith.constant 0.000000e+00 : f32
    %57 = vector.broadcast %cst_28 : f32 to vector<8x128xf32>
    %58 = arith.maximumf %56, %57 : vector<8x128xf32>
    %c1_i32_29 = arith.constant 1 : i32
    %59 = tpu.dynamic_rotate %58 by %c1_i32_29 dim 0 : vector<8x128xf32>, i32 -> vector<8x128xf32>
    %cst_30 = arith.constant 0.000000e+00 : f32
    %60 = vector.broadcast %cst_30 : f32 to vector<8x128xf32>
    %61 = arith.select %18, %59, %60 : vector<8x128xi1>, vector<8x128xf32>
    %c7_i32_31 = arith.constant 7 : i32
    %62 = tpu.dynamic_rotate %58 by %c7_i32_31 dim 0 : vector<8x128xf32>, i32 -> vector<8x128xf32>
    %cst_32 = arith.constant 0.000000e+00 : f32
    %63 = vector.broadcast %cst_32 : f32 to vector<8x128xf32>
    %64 = arith.select %20, %62, %63 : vector<8x128xi1>, vector<8x128xf32>
    %65 = tpu.concatenate %61, %58, %64 in 1 : vector<8x128xf32>, vector<8x128xf32>, vector<8x128xf32> -> vector<8x384xf32>
    %66 = arith.truncf %65 : vector<8x384xf32> to vector<8x384xbf16>
    %c0_33 = arith.constant 0 : index
    %c0_34 = arith.constant 0 : index
    %67 = vector.load %arg8[%c0_33, %c0_34] : memref<384x128xbf16, #tpu.memory_space<vmem>>, vector<384x128xbf16>
    %cst_35 = arith.constant dense<0.000000e+00> : vector<8x128xf32>
    %68 = tpu.matmul %66, %67, %cst_35 {dimension_numbers = #tpu.dot_dimension_numbers<[1], [0], [0], [1], [0, 0, 1, 1], [], []>} : vector<8x384xbf16>, vector<384x128xbf16>, vector<8x128xf32> -> vector<8x128xf32>
    %c0_36 = arith.constant 0 : index
    %c0_37 = arith.constant 0 : index
    %69 = vector.load %arg9[%c0_36, %c0_37] : memref<1x128xf32, #tpu.memory_space<vmem>>, vector<1x128xf32>
    %70 = vector.broadcast %69 : vector<1x128xf32> to vector<8x128xf32>
    %71 = arith.addf %68, %70 : vector<8x128xf32>
    %cst_38 = arith.constant 0.000000e+00 : f32
    %72 = vector.broadcast %cst_38 : f32 to vector<8x128xf32>
    %73 = arith.maximumf %71, %72 : vector<8x128xf32>
    %c1_i32_39 = arith.constant 1 : i32
    %74 = tpu.dynamic_rotate %73 by %c1_i32_39 dim 0 : vector<8x128xf32>, i32 -> vector<8x128xf32>
    %cst_40 = arith.constant 0.000000e+00 : f32
    %75 = vector.broadcast %cst_40 : f32 to vector<8x128xf32>
    %76 = arith.select %18, %74, %75 : vector<8x128xi1>, vector<8x128xf32>
    %c7_i32_41 = arith.constant 7 : i32
    %77 = tpu.dynamic_rotate %73 by %c7_i32_41 dim 0 : vector<8x128xf32>, i32 -> vector<8x128xf32>
    %cst_42 = arith.constant 0.000000e+00 : f32
    %78 = vector.broadcast %cst_42 : f32 to vector<8x128xf32>
    %79 = arith.select %20, %77, %78 : vector<8x128xi1>, vector<8x128xf32>
    %80 = tpu.concatenate %76, %73, %79 in 1 : vector<8x128xf32>, vector<8x128xf32>, vector<8x128xf32> -> vector<8x384xf32>
    %81 = arith.truncf %80 : vector<8x384xf32> to vector<8x384xbf16>
    %c0_43 = arith.constant 0 : index
    %c0_44 = arith.constant 0 : index
    %82 = vector.load %arg10[%c0_43, %c0_44] : memref<384x128xbf16, #tpu.memory_space<vmem>>, vector<384x128xbf16>
    %cst_45 = arith.constant dense<0.000000e+00> : vector<8x128xf32>
    %83 = tpu.matmul %81, %82, %cst_45 {dimension_numbers = #tpu.dot_dimension_numbers<[1], [0], [0], [1], [0, 0, 1, 1], [], []>} : vector<8x384xbf16>, vector<384x128xbf16>, vector<8x128xf32> -> vector<8x128xf32>
    %c0_46 = arith.constant 0 : index
    %c0_47 = arith.constant 0 : index
    %84 = vector.load %arg11[%c0_46, %c0_47] : memref<1x128xf32, #tpu.memory_space<vmem>>, vector<1x128xf32>
    %85 = vector.broadcast %84 : vector<1x128xf32> to vector<8x128xf32>
    %86 = arith.addf %83, %85 : vector<8x128xf32>
    %87 = arith.addf %86, %58 : vector<8x128xf32>
    %cst_48 = arith.constant 0.000000e+00 : f32
    %88 = vector.broadcast %cst_48 : f32 to vector<8x128xf32>
    %89 = arith.maximumf %87, %88 : vector<8x128xf32>
    %cst_49 = arith.constant dense<0.000000e+00> : vector<128xf32>
    %90 = vector.multi_reduction <add>, %89, %cst_49 [0] : vector<8x128xf32> to vector<128xf32>
    %91 = vector.shape_cast %90 : vector<128xf32> to vector<1x128xf32>
    %cst_50 = arith.constant 8.000000e+00 : f32
    %92 = vector.broadcast %cst_50 : f32 to vector<1x128xf32>
    %93 = arith.divf %91, %92 : vector<1x128xf32>
    %94 = vector.shape_cast %93 : vector<1x128xf32> to vector<1x128xf32>
    %95 = vector.broadcast %94 : vector<1x128xf32> to vector<8x128xf32>
    %c0_51 = arith.constant 0 : index
    %c0_52 = arith.constant 0 : index
    %c0_53 = arith.constant 0 : index
    %96 = vector.load %arg12[%c0_51, %c0_52, %c0_53] : memref<1x8x128xf32, #tpu.memory_space<vmem>>, vector<1x8x128xf32>
    %97 = vector.shape_cast %96 : vector<1x8x128xf32> to vector<8x128xf32>
    %98 = vector.shape_cast %95 : vector<8x128xf32> to vector<1x8x128xf32>
    tpu.vector_store %arg12[%c0_51, %c0_52, %c0_53], %98 {strides = array<i32>} : memref<1x8x128xf32, #tpu.memory_space<vmem>>, vector<1x8x128xf32>,
    return
  }
  func.func @transform_0(%arg0: i32) -> (i32, i32) {
    %c0_i32 = arith.constant 0 : i32
    %c0_i32_0 = arith.constant 0 : i32
    return %arg0, %c0_i32 : i32, i32
  }
  func.func @transform_1(%arg0: i32) -> (i32, i32) {
    %c0_i32 = arith.constant 0 : i32
    %c0_i32_0 = arith.constant 0 : i32
    %c0_i32_1 = arith.constant 0 : i32
    return %c0_i32, %c0_i32_0 : i32, i32
  }
  func.func @transform_2(%arg0: i32) -> (i32, i32) {
    %c0_i32 = arith.constant 0 : i32
    %c0_i32_0 = arith.constant 0 : i32
    %c0_i32_1 = arith.constant 0 : i32
    return %c0_i32, %c0_i32_0 : i32, i32
  }
  func.func @transform_3(%arg0: i32) -> (i32, i32) {
    %c0_i32 = arith.constant 0 : i32
    %c0_i32_0 = arith.constant 0 : i32
    %c0_i32_1 = arith.constant 0 : i32
    return %c0_i32, %c0_i32_0 : i32, i32
  }
  func.func @transform_4(%arg0: i32) -> (i32, i32) {
    %c0_i32 = arith.constant 0 : i32
    %c0_i32_0 = arith.constant 0 : i32
    %c0_i32_1 = arith.constant 0 : i32
    return %c0_i32, %c0_i32_0 : i32, i32
  }
  func.func @transform_5(%arg0: i32) -> (i32, i32) {
    %c0_i32 = arith.constant 0 : i32
    %c0_i32_0 = arith.constant 0 : i32
    %c0_i32_1 = arith.constant 0 : i32
    return %c0_i32, %c0_i32_0 : i32, i32
  }
  func.func @transform_6(%arg0: i32) -> (i32, i32) {
    %c0_i32 = arith.constant 0 : i32
    %c0_i32_0 = arith.constant 0 : i32
    %c0_i32_1 = arith.constant 0 : i32
    return %c0_i32, %c0_i32_0 : i32, i32
  }
  func.func @transform_7(%arg0: i32) -> (i32, i32) {
    %c0_i32 = arith.constant 0 : i32
    %c0_i32_0 = arith.constant 0 : i32
    %c0_i32_1 = arith.constant 0 : i32
    return %c0_i32, %c0_i32_0 : i32, i32
  }
  func.func @transform_8(%arg0: i32) -> (i32, i32) {
    %c0_i32 = arith.constant 0 : i32
    %c0_i32_0 = arith.constant 0 : i32
    %c0_i32_1 = arith.constant 0 : i32
    return %c0_i32, %c0_i32_0 : i32, i32
  }
  func.func @transform_9(%arg0: i32) -> (i32, i32) {
    %c0_i32 = arith.constant 0 : i32
    %c0_i32_0 = arith.constant 0 : i32
    %c0_i32_1 = arith.constant 0 : i32
    return %c0_i32, %c0_i32_0 : i32, i32
  }
  func.func @transform_10(%arg0: i32) -> (i32, i32) {
    %c0_i32 = arith.constant 0 : i32
    %c0_i32_0 = arith.constant 0 : i32
    %c0_i32_1 = arith.constant 0 : i32
    return %c0_i32, %c0_i32_0 : i32, i32
  }
  func.func @transform_11(%arg0: i32) -> (i32, i32, i32) {
    %c0_i32 = arith.constant 0 : i32
    %c0_i32_0 = arith.constant 0 : i32
    %c0_i32_1 = arith.constant 0 : i32
    return %arg0, %c0_i32, %c0_i32_0 : i32, i32, i32
  }
}

</mosaic_0001>

<bundles_post_ra>
// kernel: tpu_custom_call.1
= control target key start
LH: loop header
LB: loop body
LE: loop exit
PB: predicated region body
PF: predicated region fallthrough
CT: control target
= control target key end

     0   :  { %s2865_s0 = inlined_call_operand.hbm [shape: f32[16,32], index: 0, kind: input, shape index: {}]   ;;  %s2866_s1 = inlined_call_operand.hbm [shape: bf16[32,128], index: 1, kind: input, shape index: {}]   ;;  %s2867_s2 = inlined_call_operand.vmem [shape: f32[1,128], index: 2, kind: input, shape index: {}]   ;;  %s2868_s3 = inlined_call_operand.hbm [shape: bf16[384,128], index: 3, kind: input, shape index: {}]   ;;  %s2869_s4 = inlined_call_operand.vmem [shape: f32[1,128], index: 4, kind: input, shape index: {}]   ;;  %s2870_s5 = inlined_call_operand.hbm [shape: bf16[384,128], index: 5, kind: input, shape index: {}]   ;;  %s2871_s6 = inlined_call_operand.vmem [shape: f32[1,128], index: 6, kind: input, shape index: {}]   ;;  %s2872_s7 = inlined_call_operand.hbm [shape: bf16[384,128], index: 7, kind: input, shape index: {}]   ;;  %s2873_s8 = inlined_call_operand.vmem [shape: f32[1,128], index: 8, kind: input, shape index: {}]   ;;  %s2874_s9 = inlined_call_operand.hbm [shape: bf16[384,128], index: 9, kind: input, shape index: {}]   ;;  %s2875_s10 = inlined_call_operand.vmem [shape: f32[1,128], index: 10, kind: input, shape index: {}]   ;;  %s2876_s11 = inlined_call_operand.hbm [shape: f32[2,8,128], index: 11, kind: output, shape index: {}]  }
   0x1   :  { %2877 = sst [smem:[#allocation19_spill]] %s2866_s1 }
   0x2   :  { %2878 = sst [smem:[#allocation20_spill]] %s2868_s3 }
   0x3   :  { %2879 = sst [smem:[#allocation21_spill]] %s2870_s5 }
   0x4   :  { %2880 = sst [smem:[#allocation22_spill]] %s2872_s7 }
   0x5   :  { %2881 = sst [smem:[#allocation23_spill]] %s2874_s9 }
   0x6   :  { %16 = vsyncpa [#allocation3], 0 }
   0x7   :  { %18 = vsyncpa [#allocation3 + $0x1], 0 }
   0x8   :  { %19 = vsyncpa [#allocation6], 0 }
   0x9   :  { %20 = vsyncpa [#allocation9], 0 }
   0xa   :  { %21 = vsyncpa [#allocation12], 0 }
   0xb   :  { %22 = vsyncpa [#allocation4], 0 }
   0xc   :  { %24 = vsyncpa [#allocation4 + $0x1], 0  ;;  %s2638_s17 = smov 0   ;;  %s2640_s18 = smov 0  }
   0xd   :  { %s2642_s19 = smov 0   ;;  %s2644_s20 = smov 0  }
   0xe LB: > { %s2882_s1 = sld [smem:[#allocation19_spill]]  ;;  %s2662_s24 = sadd.s32 4294967295, %s2568_s20   ;;  %s2568_s20 = sphi %s2644_s20, %s2901_s20   ;;  %s2564_s19 = sphi %s2642_s19, %s2900_s19   ;;  %s2560_s18 = sphi %s2640_s18, %s2899_s18   ;;  %s2556_s17 = sphi %s2638_s17, %s2898_s17  }
   0xf   : > { %p1667_p0 = scmp.ge.s32.totalorder %s2568_s20, 1  ;;  %p51_p1 = scmp.eq.s32.totalorder %s2662_s24, 0 }
  0x10   : > { %p297_p2 = scmp.lt.s32.totalorder %s2568_s20, 3  ;;  %s2570_s26 = smov [#allocation5]  }
  0x11   : > { %s310_s27 = sshll.u32 %s2570_s26, 4  ;;  %s2884_s5 = sld [smem:[#allocation21_spill]]  ;;  %s311_s27 = int_to_ptr.vmem [resolvable:$true] %s310_s27 }
  0x12   : > { %p2667_p3 = pnand %p1667_p0, %p297_p2  ;;  %s2886_s3 = sld [smem:[#allocation20_spill]] }
  0x13   : > { %s2571_s16 = smov [#allocation8]   ;;  %s2572_s22 = smov 64  }
  0x14   : > { %s308_s23 = sshll.u32 %s2882_s1, 4  ;;  %p2227_p4 = pneg %p2667_p3  ;;  %s309_s23 = int_to_ptr.hbm [resolvable:$true] %s308_s23 }
  0x15   : > { %s344_s21 = sshll.u32 %s2571_s16, 4  ;;  %s2573_s26 = smov 4   ;;  %s345_s21 = int_to_ptr.vmem [resolvable:$true] %s344_s21 }
  0x16   : > { %p2679_p6 = pnand %p2227_p4, %p51_p1  ;;  %s2887_s7 = sld [smem:[#allocation22_spill]] }
  0x17   : > { %s342_s30 = sshll.u32 %s2884_s5, 4  ;;  %s2574_s5 = smov [#allocation7]   ;;  %s343_s30 = int_to_ptr.hbm [resolvable:$true] %s342_s30 }
  0x18   : > { %s325_s15 = sshll.u32 %s2886_s3, 4  ;;  %s327_s13 = sshll.u32 %s2574_s5, 4  ;;  %s326_s15 = int_to_ptr.hbm [resolvable:$true] %s325_s15  ;;  %s328_s13 = int_to_ptr.vmem [resolvable:$true] %s327_s13 }
  0x19   : > { %2230 = dma.hbm_to_vmem [thread:$0]  (!%p2679_p6), %s309_s23, 256, %s311_s27, [#allocation6], %s2572_s22, %s2572_s22, %s2573_s26  }
  0x1a   : > { %2236 = dma.hbm_to_vmem [thread:$0]  (!%p2679_p6), %s343_s30, 3072, %s345_s21, [#allocation9], %s2572_s22, %s2572_s22, %s2573_s26  }
  0x1b   : > { %2233 = dma.hbm_to_vmem [thread:$0]  (!%p2679_p6), %s326_s15, 3072, %s328_s13, [#allocation6], %s2572_s22, %s2572_s22, %s2573_s26  }
  0x1c   : > { %s359_s1 = sshll.u32 %s2887_s7, 4  ;;  %s2575_s23 = smov [#allocation10]   ;;  %s360_s1 = int_to_ptr.hbm [resolvable:$true] %s359_s1 }
  0x1d   : > { %s361_s27 = sshll.u32 %s2575_s23, 4  ;;  %s2888_s9 = sld [smem:[#allocation23_spill]]  ;;  %s362_s27 = int_to_ptr.vmem [resolvable:$true] %s361_s27 }
  0x1e   : > { %2239 = dma.hbm_to_vmem [thread:$0]  (!%p2679_p6), %s360_s1, 3072, %s362_s27, [#allocation9], %s2572_s22, %s2572_s22, %s2573_s26  }
  0x1f   : > { %s2576_s5 = smov [#allocation11]   ;;  %s1666_s15 = sadd.s32 4294967294, %s2568_s20  }
  0x20   : > { %s378_s21 = sshll.u32 %s2576_s5, 4  ;;  %s2704_s28 = sadd.s32 1, %s2568_s20   ;;  %s379_s21 = int_to_ptr.vmem [resolvable:$true] %s378_s21 }
  0x21   : > { %s37_s29 = sadd.s32 1, %s2564_s19  ;;  %s34_s13 = ssub.s32 %s2568_s20, %s2704_s28 }
  0x22   : > { %p44_p7 = scmp.ne.s32.totalorder %s2564_s19, %s2560_s18  ;;  %p35_p8 = scmp.eq.s32.totalorder %s34_s13, 0 }
  0x23   : > { %s376_s16 = sshll.u32 %s2888_s9, 4  ;;  %p45_p9 = scmp.eq.s32.totalorder %s2568_s20, 0  ;;  %s377_s16 = int_to_ptr.hbm [resolvable:$true] %s376_s16 }
  0x24   : > { %2242 = dma.hbm_to_vmem [thread:$0]  (!%p2679_p6), %s377_s16, 3072, %s379_s21, [#allocation12], %s2572_s22, %s2572_s22, %s2573_s26  }
  0x25   : > { %p50_p10 = scmp.ne.s32.totalorder %s2560_s18, %s2556_s17  ;;  %p284_p11 = scmp.eq.s32.totalorder %s2662_s24, 1 }
  0x26   : > { %s2716_s1 = scalar_select %p35_p8, %s2564_s19, %s37_s29  }
  0x27   : > { %p2720_p12 = por %p51_p1, %p50_p10  ;;  %p2724_p13 = por %p284_p11, %p44_p7 }
  0x28   : > { %p290_p0 = scmp.eq.s32.totalorder %s1666_s15, 1  ;;  %p46_p2 = por %p45_p9, %p44_p7 }
  0x29   : > { %s395_s26 = sand.u32 1, %s2564_s19   ;;  %p2256_p6 = scmp.lt.s32.totalorder %s2568_s20, 2 }
  0x2a   : > { %p2729_p4 = por %p290_p0, %p50_p10  ;;  %s1674_s27 = sshll.u32 %s395_s26, 3 }
  0x2b   : > { %s1675_s30 = sshll.u32 %s2568_s20, 3  ;;  %s399_s29 = scalar_lea.vmem [#allocation2], %s1674_s27 }
  0x2c   : > { %s403_s5 = scalar_lea.hbm %s2865_s0, %s1675_s30  ;;  %s407_s13 = sshll.u32 %s399_s29, 4  ;;  %s408_s13 = int_to_ptr.vmem [resolvable:$true] %s407_s13 }
  0x2d   : > { %s405_s21 = sshll.u32 %s403_s5, 4  ;;  %p2738_p8 = pnand %p2256_p6, %p46_p2  ;;  %s406_s21 = int_to_ptr.hbm [resolvable:$true] %s405_s21 }
  0x2e   : > { %s396_s3 = scalar_lea.sflag [#allocation3], %s395_s26  ;;  %s2460_s7 = sshra.s32 %s406_s21, 4  ;;  %s2461_s7 = int_to_ptr.hbm [resolvable:$true] %s2460_s7 }
  0x2f   : > { %s2462_s9 = scalar_lea.hbm %s2461_s7, 8  ;;  %p2464_p9 = pneg %p2738_p8 }
  0x30   : > { %p2463_p7 = scmp.ne.s32.totalorder %s2461_s7, %s2462_s9  ;;  %s2467_s27 = scalar_lea.hbm %s2865_s0, 16 }
  0x31   : > { %p2468_p0 = scmp.lt.s32.totalorder %s2461_s7, %s2865_s0  ;;  %p2469_p2 = scmp.lt.s32.totalorder %s2467_s27, %s2462_s9 }
  0x32   : > { %p2465_p10 = pnand %p2464_p9, %p2463_p7 }
  0x33   : > { %p2470_p6 = por %p2469_p2, %p2468_p0 }
  0x34   : > { %p2466_p11 = pneg %p2465_p10 }
  0x36   : > { %p2471_p5 = pnand %p2470_p6, %p2466_p11 }
  0x38   : > { %2474 = shalt.err (!%p2471_p5)
}
  0x39   : > { %2246 = dma.hbm_to_vmem [thread:$0]  (!%p2738_p8), %s406_s21, 128, %s408_s13, %s396_s3  }
  0x3a   : > { %416 = sbr.rel (%p2667_p3) target bundleno = 795 (0x31b), region = 64  ;;  %s2755_s26 = sand.u32 (!%p2667_p3), 1, %s2560_s18  }
  0x3b   : > { %s1677_s29 = sshll.u32 (!%p2667_p3), %s2755_s26, 3  ;;  %s419_s30 = scalar_lea.sflag (!%p2667_p3), [#allocation3], %s2755_s26 }
  0x3c   : > { %s422_s7 = scalar_lea.vmem (!%p2667_p3), [#allocation2], %s1677_s29 }
  0x3f   : > { %2535 = dma.done.wait (%p2720_p12), %s419_s30, 128  }
  0x40   : > { %2537 = vsyncadd (%p2720_p12), %s419_s30, 4294967168 }
  0x41   : > { %2539 = dma.done.wait (%p51_p1), [#allocation6], 3328  }
  0x42   : > { %2541 = vsyncadd (%p51_p1), [#allocation6], 4294963968 }
  0x43   : > { %2543 = dma.done.wait (%p51_p1), [#allocation9], 6144  }
  0x44   : > { %2545 = vsyncadd (%p51_p1), [#allocation9], 4294961152 }
  0x45   : > { %2547 = dma.done.wait (%p51_p1), [#allocation12], 3072  }
  0x46   : > { %2549 = vsyncadd (%p51_p1), [#allocation12], 4294964224  ;;  %v2106_v0 = vld [vmem:[#allocation5 + $0x8] sm:$0xff]  ;;  %v2105_v4 = vld [vmem:[#allocation5] sm:$0xff]  ;;  %vm526_vm0 = vcmask 261120   ;;  %v488_v40 = vlaneseq  ;;  %s2102_s5 = sshll.u32 %s2662_s24, 3 }
  0x47   : > { %v2122_v1 = vld [vmem:[#allocation7 + $0x78] sm:$0xff]  ;;  %536 = vmatpush.bf16.msra.mxu0 %v2106_v0  ;;  %v504_v5 = vld [vmem:[%s422_s7] sm:$0xff]  ;;  %v2121_v6 = vld [vmem:[#allocation7 + $0x70] sm:$0xff]  ;;  %s1543_s3 = scalar_lea.hbm %s2876_s11, %s2102_s5  ;;  %s486_s9 = scalar_lea.vmem [#allocation13], %s1677_s29 }
  0x48   : > { %v2114_v2 = vld [vmem:[#allocation7 + $0x38] sm:$0xff]  ;;  %759 = vmatpush.bf16.msra.mxu2 %v2122_v1  ;;  %v2113_v7 = vld [vmem:[#allocation7 + $0x30] sm:$0xff]  ;;  %v505_v9 = vpack.c.bf16 %v504_v5, %v504_v5  ;;  %v2120_v10 = vld [vmem:[#allocation7 + $0x68] sm:$0xff]  ;;  %v489_v42 = vshrl.u32 %v488_v40, 7  ;;  %s1545_s25 = sshll.u32 %s486_s9, 4  ;;  %s1547_s12 = sshll.u32 %s1543_s3, 4  ;;  %s1546_s25 = int_to_ptr.vmem [resolvable:$true] %s1545_s25  ;;  %s1548_s12 = int_to_ptr.hbm [resolvable:$true] %s1547_s12 }
  0x49   : > { %v2130_v3 = vld [vmem:[#allocation7 + $0xb8] sm:$0xff]  ;;  %746 = vmatpush.bf16.msra.mxu1 %v2114_v2  ;;  %v2129_v8 = vld [vmem:[#allocation7 + $0xb0] sm:$0xff]  ;;  %v2112_v11 = vld [vmem:[#allocation7 + $0x28] sm:$0xff]  ;;  %s1533_s24 = scalar_lea.sflag [#allocation4], %s2755_s26  ;;  %s2504_s21 = sshra.s32 %s1548_s12, 4  ;;  %s2505_s21 = int_to_ptr.hbm [resolvable:$true] %s2504_s21 }
  0x4a   : > { %772 = vmatpush.bf16.msra.mxu3 %v2130_v3  ;;  %v2128_v12 = vld [vmem:[#allocation7 + $0xa8] sm:$0xff]  ;;  %v2119_v13 = vld [vmem:[#allocation7 + $0x60] sm:$0xff]  ;;  %v2118_v16 = vld [vmem:[#allocation7 + $0x58] sm:$0xff]  ;;  %v494_v43 = vand.u32 7, %v489_v42  ;;  %s2506_s13 = scalar_lea.hbm %s2505_s21, 8  ;;  %s2510_s27 = scalar_lea.hbm %s2876_s11, 16 }
  0x4b   : > { %537 = vmatpush.bf16.msra.mxu0 %v2105_v4  ;;  %v2111_v14 = vld [vmem:[#allocation7 + $0x20] sm:$0xff]  ;;  %v2110_v17 = vld [vmem:[#allocation7 + $0x18] sm:$0xff]  ;;  %v2117_v19 = vld [vmem:[#allocation7 + $0x50] sm:$0xff]  ;;  %p2507_p1 = scmp.ne.s32.totalorder %s2505_s21, %s2506_s13  ;;  %p2511_p12 = scmp.lt.s32.totalorder %s2505_s21, %s2876_s11 }
  0x4c   : > { %760 = vmatpush.bf16.msra.mxu2 %v2121_v6  ;;  %v2127_v15 = vld [vmem:[#allocation7 + $0xa0] sm:$0xff]  ;;  %v2126_v18 = vld [vmem:[#allocation7 + $0x98] sm:$0xff]  ;;  %v2109_v20 = vld [vmem:[#allocation7 + $0x10] sm:$0xff]  ;;  %vm502_vm1 = vcmp.ne.s32.totalorder %v494_v43, 0  ;;  %vm503_vm2 = vcmp.ne.s32.totalorder %v494_v43, 7  ;;  %p2512_p8 = scmp.lt.s32.totalorder %s2510_s27, %s2506_s13 }
  0x4d   : > { %747 = vmatpush.bf16.msra.mxu1 %v2113_v7  ;;  %v2125_v21 = vld [vmem:[#allocation7 + $0x90] sm:$0xff]  ;;  %v2116_v22 = vld [vmem:[#allocation7 + $0x48] sm:$0xff]  ;;  %v2115_v25 = vld [vmem:[#allocation7 + $0x40] sm:$0xff]  ;;  %p2508_p3 = pnand %p2507_p1, %p2724_p13 }
  0x4e   : > { %773 = vmatpush.bf16.msra.mxu3 %v2129_v8  ;;  %1692 = vmatmul.msk.bf16.vlgmr.msra.gmra.mxu0 %vm526_vm0, %v505_v9  ;;  %v2108_v23 = vld [vmem:[#allocation7 + $0x8] sm:$0xff]  ;;  %v2107_v26 = vld [vmem:[#allocation7] sm:$0xff]  ;;  %v2146_v28 = vld [vmem:[#allocation8 + $0x78] sm:$0xff]  ;;  %p2513_p7 = por %p2512_p8, %p2511_p12 }
  0x4f   : > { %v2124_v24 = vld [vmem:[#allocation7 + $0x88] sm:$0xff]  ;;  %v2123_v27 = vld [vmem:[#allocation7 + $0x80] sm:$0xff]  ;;  %v2138_v29 = vld [vmem:[#allocation8 + $0x38] sm:$0xff]  ;;  %p2509_p5 = pneg %p2508_p3 }
  0x50   : > { %761 = vmatpush.bf16.msra.mxu2 %v2120_v10  ;;  %v2154_v30 = vld [vmem:[#allocation8 + $0xb8] sm:$0xff]  ;;  %989 = vmatpush.bf16.msrb.mxu0 %v2138_v29  ;;  %v2145_v31 = vld [vmem:[#allocation8 + $0x70] sm:$0xff]  ;;  %v2144_v34 = vld [vmem:[#allocation8 + $0x68] sm:$0xff] }
  0x51   : > { %748 = vmatpush.bf16.msra.mxu1 %v2112_v11  ;;  %v2137_v32 = vld [vmem:[#allocation8 + $0x30] sm:$0xff]  ;;  %v2136_v35 = vld [vmem:[#allocation8 + $0x28] sm:$0xff]  ;;  %v2143_v37 = vld [vmem:[#allocation8 + $0x60] sm:$0xff]  ;;  %p2514_p9 = pnand %p2513_p7, %p2509_p5 }
  0x52   : > { %774 = vmatpush.bf16.msra.mxu3 %v2128_v12  ;;  %v2153_v33 = vld [vmem:[#allocation8 + $0xb0] sm:$0xff]  ;;  %v2152_v36 = vld [vmem:[#allocation8 + $0xa8] sm:$0xff]  ;;  %v2135_v38 = vld [vmem:[#allocation8 + $0x20] sm:$0xff] }
  0x53   : > { %v2151_v39 = vld [vmem:[#allocation8 + $0xa0] sm:$0xff]  ;;  %v2142_v41 = vld [vmem:[#allocation8 + $0x58] sm:$0xff]  ;;  %vm2785_vm3 = vmpackc.low %vm502_vm1, %vm502_vm1 }
  0x54   : > { %762 = vmatpush.bf16.msra.mxu2 %v2119_v13  ;;  %990 = vmatpush.bf16.msrb.mxu0 %v2137_v32  ;;  %v2303_v44 = vld [vmem:[%s2867_s2] ss:$0 sm:$0xff]  ;;  %vm2790_vm4 = vmpackc.low %vm503_vm2, %vm503_vm2  ;;  %v2134_v55 = vld [vmem:[#allocation8 + $0x18] sm:$0xff] }
  0x55   : > { %749 = vmatpush.bf16.msra.mxu1 %v2111_v14  ;;  %v2150_v56 = vld [vmem:[#allocation8 + $0x98] sm:$0xff]  ;;  %v2141_v57 = vld [vmem:[#allocation8 + $0x50] sm:$0xff]  ;;  %v2140_v60 = vld [vmem:[#allocation8 + $0x48] sm:$0xff] }
  0x56   : > { %775 = vmatpush.bf16.msra.mxu3 %v2127_v15  ;;  %v2133_v58 = vld [vmem:[#allocation8 + $0x10] sm:$0xff]  ;;  %v2132_v61 = vld [vmem:[#allocation8 + $0x8] sm:$0xff]  ;;  %v2139_v63 = vld [vmem:[#allocation8 + $0x40] sm:$0xff] }
  0x57   : > { %v2149_v59 = vld [vmem:[#allocation8 + $0x90] sm:$0xff]  ;;  %v2148_v62 = vld [vmem:[#allocation8 + $0x88] sm:$0xff]  ;;  %v2131_v0 = vld [vmem:[#allocation8] sm:$0xff] }
  0x58   : > { %763 = vmatpush.bf16.msra.mxu2 %v2118_v16  ;;  %991 = vmatpush.bf16.msrb.mxu0 %v2136_v35  ;;  %v2147_v1 = vld [vmem:[#allocation8 + $0x80] sm:$0xff]  ;;  %v2170_v2 = vld [vmem:[#allocation10 + $0x78] sm:$0xff]  ;;  %v2169_v5 = vld [vmem:[#allocation10 + $0x70] sm:$0xff] }
  0x59   : > { %750 = vmatpush.bf16.msra.mxu1 %v2110_v17  ;;  %v2162_v3 = vld [vmem:[#allocation10 + $0x38] sm:$0xff]  ;;  %v2161_v6 = vld [vmem:[#allocation10 + $0x30] sm:$0xff]  ;;  %v2168_v8 = vld [vmem:[#allocation10 + $0x68] sm:$0xff] }
  0x5a   : > { %776 = vmatpush.bf16.msra.mxu3 %v2126_v18  ;;  %v2178_v4 = vld [vmem:[#allocation10 + $0xb8] sm:$0xff]  ;;  %v2177_v7 = vld [vmem:[#allocation10 + $0xb0] sm:$0xff]  ;;  %v2160_v9 = vld [vmem:[#allocation10 + $0x28] sm:$0xff] }
  0x5b   : > { %v2176_v10 = vld [vmem:[#allocation10 + $0xa8] sm:$0xff]  ;;  %v2167_v11 = vld [vmem:[#allocation10 + $0x60] sm:$0xff]  ;;  %v2174_v32 = vld [vmem:[#allocation10 + $0x98] sm:$0xff] }
  0x5c   : > { %764 = vmatpush.bf16.msra.mxu2 %v2117_v19  ;;  %992 = vmatpush.bf16.msrb.mxu0 %v2135_v38  ;;  %v2304_v12 = vld [vmem:[%s2869_s4] ss:$0 sm:$0xff]  ;;  %v2173_v35 = vld [vmem:[#allocation10 + $0x90] sm:$0xff]  ;;  %v2172_v38 = vld [vmem:[#allocation10 + $0x88] sm:$0xff] }
  0x5d   : > { %751 = vmatpush.bf16.msra.mxu1 %v2109_v20  ;;  %v2175_v29 = vld [vmem:[#allocation10 + $0xa0] sm:$0xff]  ;;  %v2194_v42 = vld [vmem:[#allocation11 + $0x78] sm:$0xff] }
  0x5e   : > { %777 = vmatpush.bf16.msra.mxu3 %v2125_v21  ;;  %v2155_v40 = vld [vmem:[#allocation10] sm:$0xff]  ;;  %v2186_v43 = vld [vmem:[#allocation11 + $0x38] sm:$0xff] }
  0x60   : > { %765 = vmatpush.bf16.msra.mxu2 %v2116_v22  ;;  %993 = vmatpush.bf16.msrb.mxu0 %v2134_v55 }
  0x61   : > { %752 = vmatpush.bf16.msra.mxu1 %v2108_v23 }
  0x62   : > { %778 = vmatpush.bf16.msra.mxu3 %v2124_v24 }
  0x64   : > { %766 = vmatpush.bf16.msra.mxu2 %v2115_v25  ;;  %994 = vmatpush.bf16.msrb.mxu0 %v2133_v58 }
  0x65   : > { %753 = vmatpush.bf16.msra.mxu1 %v2107_v26 }
  0x66   : > { %779 = vmatpush.bf16.msra.mxu3 %v2123_v27 }
  0x68   : > { %1015 = vmatpush.bf16.msrb.mxu2 %v2154_v30  ;;  %995 = vmatpush.bf16.msrb.mxu0 %v2132_v61  ;;  %v2166_v30 = vld [vmem:[#allocation10 + $0x58] sm:$0xff] }
  0x69   : > { %1002 = vmatpush.bf16.msrb.mxu1 %v2146_v28  ;;  %v2159_v28 = vld [vmem:[#allocation10 + $0x20] sm:$0xff] }
  0x6a   : > { %1233 = vmatpush.bf16.msrb.mxu3 %v2162_v3 }
  0x6c   : > { %1016 = vmatpush.bf16.msrb.mxu2 %v2153_v33  ;;  %996 = vmatpush.bf16.msrb.mxu0 %v2131_v0  ;;  %v2165_v33 = vld [vmem:[#allocation10 + $0x50] sm:$0xff] }
  0x6d   : > { %1003 = vmatpush.bf16.msrb.mxu1 %v2145_v31  ;;  %v2158_v31 = vld [vmem:[#allocation10 + $0x18] sm:$0xff] }
  0x6e   : > { %1234 = vmatpush.bf16.msrb.mxu3 %v2161_v6 }
  0x70   : > { %1017 = vmatpush.bf16.msrb.mxu2 %v2152_v36  ;;  %1246 = vmatpush.bf16.msra.mxu0 %v2170_v2  ;;  %v2164_v36 = vld [vmem:[#allocation10 + $0x48] sm:$0xff] }
  0x71   : > { %1004 = vmatpush.bf16.msrb.mxu1 %v2144_v34  ;;  %v2157_v34 = vld [vmem:[#allocation10 + $0x10] sm:$0xff] }
  0x72   : > { %1235 = vmatpush.bf16.msrb.mxu3 %v2160_v9  ;;  %v2190_v9 = vld [vmem:[#allocation11 + $0x58] sm:$0xff] }
  0x74   : > { %1018 = vmatpush.bf16.msrb.mxu2 %v2151_v39  ;;  %1247 = vmatpush.bf16.msra.mxu0 %v2169_v5  ;;  %v2163_v39 = vld [vmem:[#allocation10 + $0x40] sm:$0xff] }
  0x75   : > { %1005 = vmatpush.bf16.msrb.mxu1 %v2143_v37  ;;  %v2156_v37 = vld [vmem:[#allocation10 + $0x8] sm:$0xff] }
  0x76   : > { %1236 = vmatpush.bf16.msrb.mxu3 %v2159_v28 }
  0x78   : > { %1019 = vmatpush.bf16.msrb.mxu2 %v2150_v56  ;;  %1248 = vmatpush.bf16.msra.mxu0 %v2168_v8  ;;  %v2199_v8 = vld [vmem:[#allocation11 + $0xa0] sm:$0xff] }
  0x79   : > { %1006 = vmatpush.bf16.msrb.mxu1 %v2142_v41  ;;  %v2171_v41 = vld [vmem:[#allocation10 + $0x80] sm:$0xff] }
  0x7a   : > { %1237 = vmatpush.bf16.msrb.mxu3 %v2158_v31 }
  0x7c   : > { %1020 = vmatpush.bf16.msrb.mxu2 %v2149_v59  ;;  %1249 = vmatpush.bf16.msra.mxu0 %v2167_v11  ;;  %v2198_v11 = vld [vmem:[#allocation11 + $0x98] sm:$0xff] }
  0x7d   : > { %1007 = vmatpush.bf16.msrb.mxu1 %v2141_v57 }
  0x7e   : > { %1238 = vmatpush.bf16.msrb.mxu3 %v2157_v34 }
  0x80   : > { %1021 = vmatpush.bf16.msrb.mxu2 %v2148_v62  ;;  %1250 = vmatpush.bf16.msra.mxu0 %v2166_v30 }
  0x81   : > { %1008 = vmatpush.bf16.msrb.mxu1 %v2140_v60 }
  0x82   : > { %1239 = vmatpush.bf16.msrb.mxu3 %v2156_v37 }
  0x84   : > { %1022 = vmatpush.bf16.msrb.mxu2 %v2147_v1  ;;  %1251 = vmatpush.bf16.msra.mxu0 %v2165_v33 }
  0x85   : > { %1009 = vmatpush.bf16.msrb.mxu1 %v2139_v63 }
  0x86   : > { %1240 = vmatpush.bf16.msrb.mxu3 %v2155_v40 }
  0x88   : > { %1252 = vmatpush.bf16.msra.mxu0 %v2164_v36 }
  0x8c   : > { %1253 = vmatpush.bf16.msra.mxu0 %v2163_v39  ;;  %v2307_v39 = vld [vmem:[%s2875_s10] ss:$0 sm:$0xff] }
  0xcb   : > { %v539_v45 = vpop.f32.mrf.mxu0 }
  0xcc   : > { %v2780_v46 = vadd.f32 %v2303_v44, %v539_v45  ;;  %v2202_v44 = vld [vmem:[#allocation11 + $0xb8] sm:$0xff]  ;;  %v2193_v45 = vld [vmem:[#allocation11 + $0x70] sm:$0xff] }
  0xce   : > { %v548_v47 = vpack.c.bf16 %v2780_v46, %v2780_v46  ;;  %v543_v48 = vrot.slane %v2780_v46, 7  ;;  %v545_v50 = vrot.slane %v2780_v46, 1 }
  0xd0   : > { %767 = vmatmul.bf16.vlgmr.msra.gmra.mxu2 %v548_v47  ;;  %v1790_v52 = vpack.c.bf16 %v543_v48, %v543_v48  ;;  %v1793_v53 = vpack.c.bf16 %v545_v50, %v545_v50  ;;  %v2185_v47 = vld [vmem:[#allocation11 + $0x30] sm:$0xff]  ;;  %v2192_v50 = vld [vmem:[#allocation11 + $0x68] sm:$0xff] }
  0xd1   : > { %1476 = vmatpush.bf16.msra.mxu2 %v2186_v43  ;;  %v2201_v48 = vld [vmem:[#allocation11 + $0xb0] sm:$0xff] }
  0xd2   : > { %1791 = vmatmul.msk.bf16.vlgmr.msra.gmra.mxu1 %vm2785_vm3, %v1790_v52  ;;  %1794 = vmatmul.msk.bf16.vlgmr.msra.gmra.mxu3 %vm2790_vm4, %v1793_v53  ;;  %v2184_v52 = vld [vmem:[#allocation11 + $0x28] sm:$0xff] }
  0xd3   : > { %v541_v54 = vpop.f32.mrf.mxu0  ;;  %1259 = vmatpush.bf16.msra.mxu1 %v2178_v4  ;;  %1489 = vmatpush.bf16.msra.mxu3 %v2194_v42  ;;  %v2200_v53 = vld [vmem:[#allocation11 + $0xa8] sm:$0xff] }
  0xd4   : > { %v2305_v54 = vld [vmem:[%s2871_s6] ss:$0 sm:$0xff] }
  0xd5   : > { %1477 = vmatpush.bf16.msra.mxu2 %v2185_v47 }
  0xd7   : > { %1260 = vmatpush.bf16.msra.mxu1 %v2177_v7  ;;  %1490 = vmatpush.bf16.msra.mxu3 %v2193_v45  ;;  %v2183_v7 = vld [vmem:[#allocation11 + $0x20] sm:$0xff] }
  0xd9   : > { %1478 = vmatpush.bf16.msra.mxu2 %v2184_v52 }
  0xdb   : > { %1261 = vmatpush.bf16.msra.mxu1 %v2176_v10  ;;  %1491 = vmatpush.bf16.msra.mxu3 %v2192_v50  ;;  %v2182_v10 = vld [vmem:[#allocation11 + $0x18] sm:$0xff] }
  0xdd   : > { %1479 = vmatpush.bf16.msra.mxu2 %v2183_v7 }
  0xdf   : > { %1262 = vmatpush.bf16.msra.mxu1 %v2175_v29 }
  0xe1   : > { %1480 = vmatpush.bf16.msra.mxu2 %v2182_v10 }
  0xe3   : > { %1263 = vmatpush.bf16.msra.mxu1 %v2174_v32 }
  0xe7   : > { %1264 = vmatpush.bf16.msra.mxu1 %v2173_v35 }
  0xeb   : > { %1265 = vmatpush.bf16.msra.mxu1 %v2172_v38  ;;  %v2577_v38 = vmov 8.0  }
  0xec   : > { %2308 = vrcp.f32 %v2577_v38 }
  0xef   : > { %1266 = vmatpush.bf16.msra.mxu1 %v2171_v41 }
  0xf2   : > { %v2309_v42 = vpop.eup %2308 }
  0xf3   : > { %v1524_v47 = vmul.f32 8.0, %v2309_v42  ;;  %vm1528_vm5 = vweird.f32 %v2309_v42 }
  0xf5   : > { %v1525_v52 = vsub.f32 1.0, %v1524_v47 }
 0x14f   : > { %v755_v13 = vpop.f32.mrf.mxu1 }
 0x150   : > { %v756_v14 = vadd.f32 %v2304_v12, %v755_v13  ;;  %v2189_v12 = vld [vmem:[#allocation11 + $0x50] sm:$0xff] }
 0x151   : > { %v2181_v13 = vld [vmem:[#allocation11 + $0x10] sm:$0xff] }
 0x152   : > { %1481 = vmatpush.bf16.msra.mxu2 %v2181_v13 }
 0x153   : > { %v768_v15 = vpop.f32.mrf.mxu2 }
 0x154   : > { %v769_v16 = vadd.f32 %v768_v15, %v756_v14  ;;  %v2197_v14 = vld [vmem:[#allocation11 + $0x90] sm:$0xff]  ;;  %v2188_v15 = vld [vmem:[#allocation11 + $0x48] sm:$0xff] }
 0x155   : > { %v781_v17 = vpop.f32.mrf.mxu3 }
 0x156   : > { %v782_v18 = vadd.f32 %v781_v17, %v769_v16  ;;  %v2180_v16 = vld [vmem:[#allocation11 + $0x8] sm:$0xff] }
 0x157   : > { %v757_v19 = vpop.f32.mrf.mxu1  ;;  %v2196_v17 = vld [vmem:[#allocation11 + $0x88] sm:$0xff]  ;;  %1482 = vmatpush.bf16.msra.mxu2 %v2180_v16 }
 0x158   : > { %v785_v20 = vmax.f32 %v782_v18, 0.0  ;;  %v2187_v18 = vld [vmem:[#allocation11 + $0x40] sm:$0xff] }
 0x159   : > { %v2179_v19 = vld [vmem:[#allocation11] sm:$0xff] }
 0x15a   : > { %v786_v21 = vrot.slane %v785_v20, 7  ;;  %v788_v22 = vrot.slane %v785_v20, 1  ;;  %v791_v23 = vpack.c.bf16 %v785_v20, %v785_v20  ;;  %v2195_v20 = vld [vmem:[#allocation11 + $0x80] sm:$0xff] }
 0x15b   : > { %v770_v24 = vpop.f32.mrf.mxu2  ;;  %1483 = vmatpush.bf16.msra.mxu2 %v2179_v19 }
 0x15c   : > { %v1892_v25 = vpack.c.bf16 %v786_v21, %v786_v21  ;;  %v1895_v26 = vpack.c.bf16 %v788_v22, %v788_v22  ;;  %1010 = vmatmul.bf16.vlgmr.msrb.gmra.mxu1 %v791_v23  ;;  %v2306_v23 = vld [vmem:[%s2873_s8] ss:$0 sm:$0xff] }
 0x15d   : > { %v783_v27 = vpop.f32.mrf.mxu3 }
 0x15e   : > { %1893 = vmatmul.msk.bf16.vlgmr.msrb.gmra.mxu0 %vm2785_vm3, %v1892_v25  ;;  %1896 = vmatmul.msk.bf16.vlgmr.msrb.gmra.mxu2 %vm2790_vm4, %v1895_v26 }
 0x15f   : > { %1502 = vmatpush.bf16.msrb.mxu0 %v2202_v44 }
 0x163   : > { %1503 = vmatpush.bf16.msrb.mxu0 %v2201_v48 }
 0x167   : > { %1504 = vmatpush.bf16.msrb.mxu0 %v2200_v53 }
 0x16b   : > { %1505 = vmatpush.bf16.msrb.mxu0 %v2199_v8 }
 0x16f   : > { %1506 = vmatpush.bf16.msrb.mxu0 %v2198_v11 }
 0x173   : > { %1507 = vmatpush.bf16.msrb.mxu0 %v2197_v14 }
 0x177   : > { %1508 = vmatpush.bf16.msrb.mxu0 %v2196_v17 }
 0x17b   : > { %1509 = vmatpush.bf16.msrb.mxu0 %v2195_v20 }
 0x1d9   : > { %v1011_v55 = vpop.f32.mrf.mxu1 }
 0x1db   : > { %v998_v56 = vpop.f32.mrf.mxu0 }
 0x1dc   : > { %v999_v57 = vadd.f32 %v2305_v54, %v998_v56 }
 0x1de   : > { %v1012_v58 = vadd.f32 %v1011_v55, %v999_v57  ;;  %v1526_v55 = vmul.f32 %v2309_v42, %v1525_v52 }
 0x1e1   : > { %v1013_v59 = vpop.f32.mrf.mxu1  ;;  %v1024_v60 = vpop.f32.mrf.mxu2 }
 0x1e2   : > { %v1025_v61 = vadd.f32 %v1024_v60, %v1012_v58  ;;  %v1527_v58 = vadd.f32 %v2309_v42, %v1526_v55 }
 0x1e3   : > { %v1000_v62 = vpop.f32.mrf.mxu0 }
 0x1e4   : > { %v1028_v63 = vadd.f32 %v1025_v61, %v2780_v46  ;;  %v2191_v46 = vld [vmem:[#allocation11 + $0x60] sm:$0xff]  ;;  %v1529_v61 = vsel %vm1528_vm5, %v2309_v42, %v1527_v58 }
 0x1e5   : > { %1492 = vmatpush.bf16.msra.mxu3 %v2191_v46 }
 0x1e6   : > { %v2809_v0 = vmax.f32 %v1028_v63, 0.0 }
 0x1e8   : > { %v1032_v1 = vrot.slane %v2809_v0, 1  ;;  %v1035_v2 = vpack.c.bf16 %v2809_v0, %v2809_v0  ;;  %v1030_v3 = vrot.slane %v2809_v0, 7 }
 0x1e9   : > { %v1026_v4 = vpop.f32.mrf.mxu2  ;;  %1493 = vmatpush.bf16.msra.mxu3 %v2190_v9 }
 0x1ea   : > { %v1997_v5 = vpack.c.bf16 %v1032_v1, %v1032_v1  ;;  %1254 = vmatmul.bf16.vlgmr.msra.gmra.mxu0 %v1035_v2  ;;  %v1994_v6 = vpack.c.bf16 %v1030_v3, %v1030_v3 }
 0x1ec   : > { %1995 = vmatmul.msk.bf16.vlgmr.msrb.gmra.mxu3 %vm2785_vm3, %v1994_v6  ;;  %1998 = vmatmul.msk.bf16.vlgmr.msra.gmra.mxu1 %vm2790_vm4, %v1997_v5 }
 0x1ed   : > { %1494 = vmatpush.bf16.msra.mxu3 %v2189_v12 }
 0x1f1   : > { %1495 = vmatpush.bf16.msra.mxu3 %v2188_v15 }
 0x1f5   : > { %1496 = vmatpush.bf16.msra.mxu3 %v2187_v18 }
 0x267   : > { %v1255_v21 = vpop.f32.mrf.mxu0 }
 0x269   : > { %v1268_v22 = vpop.f32.mrf.mxu1 }
 0x26f   : > { %v1242_v24 = vpop.f32.mrf.mxu3  ;;  %v1257_v25 = vpop.f32.mrf.mxu0 }
 0x270   : > { %v1243_v26 = vadd.f32 %v2306_v23, %v1242_v24 }
 0x271   : > { %v1270_v27 = vpop.f32.mrf.mxu1 }
 0x272   : > { %v1256_v28 = vadd.f32 %v1255_v21, %v1243_v26 }
 0x274   : > { %v1269_v29 = vadd.f32 %v1268_v22, %v1256_v28 }
 0x276   : > { %v1272_v30 = vmax.f32 %v1269_v29, 0.0 }
 0x277   : > { %v1244_v31 = vpop.f32.mrf.mxu3 }
 0x278   : > { %v1273_v32 = vrot.slane %v1272_v30, 7  ;;  %v1275_v33 = vrot.slane %v1272_v30, 1  ;;  %v1278_v34 = vpack.c.bf16 %v1272_v30, %v1272_v30 }
 0x27a   : > { %v2096_v35 = vpack.c.bf16 %v1273_v32, %v1273_v32  ;;  %v2099_v36 = vpack.c.bf16 %v1275_v33, %v1275_v33  ;;  %1497 = vmatmul.bf16.vlgmr.msra.gmra.mxu3 %v1278_v34 }
 0x27c   : > { %2097 = vmatmul.msk.bf16.vlgmr.msra.gmra.mxu2 %vm2785_vm3, %v2096_v35  ;;  %2100 = vmatmul.msk.bf16.vlgmr.msrb.gmra.mxu0 %vm2790_vm4, %v2099_v36 }
 0x2f9   : > { %v1511_v37 = vpop.f32.mrf.mxu0 }
 0x2fd   : > { %v1498_v40 = vpop.f32.mrf.mxu3 }
 0x2ff   : > { %v1485_v41 = vpop.f32.mrf.mxu2 }
 0x300   : > { %v1486_v43 = vadd.f32 %v2307_v39, %v1485_v41 }
 0x301   : > { %v1513_v44 = vpop.f32.mrf.mxu0 }
 0x302   : > { %v1499_v45 = vadd.f32 %v1498_v40, %v1486_v43 }
 0x304   : > { %v1512_v49 = vadd.f32 %v1511_v37, %v1499_v45 }
 0x305   : > { %v1500_v48 = vpop.f32.mrf.mxu3 }
 0x306   : > { %v1515_v51 = vadd.f32 %v1512_v49, %v2809_v0 }
 0x307   : > { %v1487_v50 = vpop.f32.mrf.mxu2 }
 0x308   : > { %v1516_v53 = vmax.f32 %v1515_v51, 0.0 }
 0x30a   : > { %v1517_v54 = vrot.slane %v1516_v53, 4 }
 0x30c   : > { %v1518_v56 = vadd.f32 %v1517_v54, %v1516_v53 }
 0x30e   : > { %v1519_v57 = vrot.slane %v1518_v56, 2 }
 0x310   : > { %v1520_v59 = vadd.f32 %v1519_v57, %v1518_v56 }
 0x312   : > { %v1521_v60 = vrot.slane %v1520_v59, 1 }
 0x314   : > { %v1522_v62 = vadd.f32 %v1521_v60, %v1520_v59 }
 0x316   : > { %v1530_v63 = vmul.f32 %v1529_v61, %v1522_v62 }
 0x318   : > { %1531 = vst [vmem:[%s486_s9] sm:$0xff] %v1530_v63 }
 0x319   : > { %2517 = shalt.err (!%p2514_p9)
}
 0x31a   : > { %2225 = dma.vmem_to_hbm [thread:$0]  (%p2724_p13), %s1546_s25, 128, %s1548_s12, %s1533_s24  }
 0x31b PF: > { %s1559_s26 = sand.u32 1, %s2556_s17   ;;  %p2897_p10 = scmp.ge.s32.totalorder %s2568_s20, 2 }
 0x31c   : > { %s1560_s5 = scalar_lea.sflag [#allocation4], %s1559_s26 }
 0x31d   : > { %p2248_p11 = pnand %p2897_p10, %p2729_p4 }
 0x31f   : > { %p2249_p0 = pneg %p2248_p11 }
 0x321   : > { %2551 = dma.done.wait (%p2249_p0), %s1560_s5, 128  }
 0x322   : > { %2553 = vsyncadd (%p2249_p0), %s1560_s5, 4294967168  ;;  %p27_p2 = scmp.ge.s32.totalorder %s2704_s28, 4   ;;  %s2898_s17 = smov %s2560_s18 }
 0x323   : > { %s2899_s18 = smov %s2564_s19  ;;  %s2900_s19 = smov %s2716_s1 }
 0x324   : > { %s2901_s20 = smov %s2704_s28  ;;  %29 = sbr.rel (!%p27_p2) target bundleno = 14 (0xe), region = 129 }
 0x329   :  { %1566 = vsyncpa [#allocation3], 1 }
 0x32a   :  { %1568 = vsyncpa [#allocation3 + $0x1], 1 }
 0x32b   :  { %1569 = vsyncpa [#allocation6], 1 }
 0x32c   :  { %1570 = vsyncpa [#allocation9], 1 }
 0x32d   :  { %1571 = vsyncpa [#allocation12], 1 }
 0x32e   :  { %1572 = vsyncpa [#allocation4], 1 }
 0x32f   :  { %1574 = vsyncpa [#allocation4 + $0x1], 1 }

</bundles_post_ra>
